<compile_context>
chip_gen: v7x
topology: tpu7x:2x2x1
jax: 0.10.0
libtpu: 0.0.40
codegen_flags: <defaults>
</compile_context>

<pallas_src>
import functools
import math

import jax
import jax.numpy as jnp
from jax import lax
from jax.experimental import pallas as pl
from jax.experimental.pallas import tpu as pltpu


# ----------------------------------------------------------------------------
# Pallas kernel: one MXU contraction per (batch, lane-tile) grid step.
# ----------------------------------------------------------------------------
def _deform_matmul_kernel(w_ref, b_ref, cols_ref, o_ref):
    """Per grid step (n, j):
      w_ref    : (OC_pad, C*K*K) bf16  resident deform weights
      b_ref    : (OC_pad, 1)     f32   resident bias
      cols_ref : (C*K*K, ts)     bf16  pre-combined modulated bilinear columns
      o_ref    : (OC_pad, ts)    f32   lane-dense output tile of (N, OC, S)
    Single dot over the full C*K*K depth, f32 accumulation, bias fused into
    the tile write (no tap loop, no vreg-resident accumulator).
    """
    o_ref[...] = (
        jnp.dot(w_ref[...], cols_ref[...], preferred_element_type=jnp.float32)
        + b_ref[...]
    )


def _cdiv(a, b):
    return -(-a // b)


def _pick_lane_tile(s, n_batch, ckk, oc_pad, ts_cap=512,
                    vmem_budget=24 * 1024 * 1024):
    """Largest multiple-of-128 lane tile that (a) fits the VMEM budget
    (double-buffered column stream + output), (b) does not exceed the padded
    per-batch spatial size, (c) leaves >= 4 total grid steps (>= 2 per v7x
    TensorCore) whenever the problem allows.  ts_cap=512 is v7x-safe; sweep
    1024-2048 on v5e/v6e (per-step overhead ~0.35 us)."""
    ckk_pad = _cdiv(ckk, 16) * 16          # bf16 sublane packing of the stream
    ocp = _cdiv(oc_pad, 8) * 8             # f32 sublane packing of the output
    per_lane = 2 * ckk_pad * 2 + 2 * ocp * 4   # double-buffered cols + out, B/lane
    ts_vmem = max(128, (vmem_budget // per_lane) // 128 * 128)
    ts = min(ts_cap, ts_vmem, max(128, _cdiv(s, 128) * 128))
    while ts > 128 and n_batch * _cdiv(s, ts) < 4:
        ts -= 128
    return int(ts)


def _vmem_limit_bytes(ckk, oc_pad, ts):
    """Explicit, buffer-sum-derived VMEM limit (generation-safe: capped at
    32 MiB, below v7x's 64 MiB physical)."""
    ckk_pad = _cdiv(ckk, 16) * 16
    ocp = _cdiv(oc_pad, 8) * 8
    stream = 2 * ckk_pad * ts * 2                       # cols double buffer (bf16)
    out = 2 * ocp * ts * 4                              # output double buffer (f32)
    resident = (_cdiv(oc_pad, 16) * 16) * (_cdiv(ckk, 128) * 128) * 2 \
               + ocp * 128 * 4                          # weights + bias (lane-padded)
    total = stream + out + resident
    return int(min(32 << 20, max(8 << 20, 2 * total + (4 << 20))))


def deform_matmul(weight, bias, cols, ts=None):
    """weight: (OC, C, K, K) f32; bias: (OC,) f32
       cols:   (N, C*K*K, S) bf16   pre-combined modulated bilinear columns
       -> (N, OC_pad, S) f32  (caller slices OC_pad -> OC; no transposes)."""
    oc, c, k, _ = weight.shape
    ckk = c * k * k
    n_batch, ckk_in, s = cols.shape
    assert ckk_in == ckk, (ckk_in, ckk)
    oc_pad = max(8, _cdiv(oc, 8) * 8)      # f32 output sublane multiple
    if ts is None:
        ts = _pick_lane_tile(s, n_batch, ckk, oc_pad)
    grid = (n_batch, _cdiv(s, ts))

    # (OC, C, K, K) -> (OC_pad, C*K*K): channel-major / tap-minor, matching the
    # column row ordering (N, C, KK, S).reshape(N, C*KK, S) -- no transpose.
    w_r = weight.reshape(oc, ckk).astype(jnp.bfloat16)
    if oc_pad != oc:
        w_r = jnp.zeros((oc_pad, ckk), jnp.bfloat16).at[:oc].set(w_r)
    b_r = jnp.zeros((oc_pad, 1), jnp.float32).at[:oc, 0].set(bias)

    out = pl.pallas_call(
        _deform_matmul_kernel,
        out_shape=jax.ShapeDtypeStruct((n_batch, oc_pad, s), jnp.float32),
        grid_spec=pltpu.PrefetchScalarGridSpec(
            num_scalar_prefetch=0,
            grid=grid,
            in_specs=[
                pl.BlockSpec((oc_pad, ckk), lambda n, j: (0, 0)),    # resident weights
                pl.BlockSpec((oc_pad, 1), lambda n, j: (0, 0)),      # resident bias
                # Streamed combined columns; batch dim squeezed -> 2-D block
                # (no sublane padding blowup).  On v5e, when DMA is exposed,
                # pipeline_mode=pl.Buffered(3) here is a cheap further option.
                pl.BlockSpec((None, ckk, ts), lambda n, j: (n, 0, j)),
            ],
            out_specs=pl.BlockSpec((None, oc_pad, ts), lambda n, j: (n, 0, j)),
        ),
        compiler_params=pltpu.CompilerParams(
            dimension_semantics=("parallel", "parallel"),
            vmem_limit_bytes=_vmem_limit_bytes(ckk, oc_pad, ts),
        ),
    )(w_r, b_r, cols)
    return out


# ----------------------------------------------------------------------------
# DeformConv2d forward (matches the PyTorch module / torchvision semantics).
# ----------------------------------------------------------------------------
def deform_conv2d_forward(x, params, kernel_size=3, stride=(1, 1), padding=1,
                          dilation=1):
    stride = stride if isinstance(stride, tuple) else (stride, stride)
    N, C, H, W = x.shape
    K = kernel_size
    KK = K * K
    weight, bias = params["weight"], params["bias"]
    w_om, b_om = params["conv_offset_mask_w"], params["conv_offset_mask_b"]
    OC = weight.shape[0]
    sh, sw = stride

    # --- conv_offset_mask: native XLA conv (3*KK output rows; im2col+matmul
    # would materialize a 9x-input tensor for no benefit). ---
    om = lax.conv_general_dilated(
        x, w_om, window_strides=stride,
        padding=[(padding, padding), (padding, padding)],
        rhs_dilation=(dilation, dilation),
        dimension_numbers=("NCHW", "OIHW", "NCHW"))
    om = om + b_om[None, :, None, None]
    ho, wo = om.shape[2], om.shape[3]
    S = ho * wo

    # Module semantics: offset = cat(o1, o2); torchvision reads interleaved
    # (dy, dx) pairs per tap: dy_k = offset[:, 2k], dx_k = offset[:, 2k+1].
    o1, o2 = om[:, :KK], om[:, KK:2 * KK]
    mask = jax.nn.sigmoid(om[:, 2 * KK:])                        # (N, KK, ho, wo)
    off = jnp.concatenate([o1, o2], axis=1).reshape(N, KK, 2, ho, wo)
    dy, dx = off[:, :, 0], off[:, :, 1]                          # (N, KK, ho, wo)

    # --- sampling positions + per-corner modulation weights (small tensors) ---
    k_idx = jnp.arange(KK)
    i_k = (k_idx // K).astype(jnp.float32)
    j_k = (k_idx % K).astype(jnp.float32)
    h_out = jnp.arange(ho, dtype=jnp.float32)
    w_out = jnp.arange(wo, dtype=jnp.float32)
    base_y = h_out[None, :, None] * sh - padding + i_k[:, None, None] * dilation
    base_x = w_out[None, None, :] * sw - padding + j_k[:, None, None] * dilation
    py = base_y[None] + dy                                       # (N, KK, ho, wo)
    px = base_x[None] + dx

    valid = (py > -1.0) & (py < H) & (px > -1.0) & (px < W)
    y0 = jnp.floor(py)
    x0 = jnp.floor(px)
    ly, lx = py - y0, px - x0
    hy, hx = 1.0 - ly, 1.0 - lx

    # Corner axis right after N so the gather output is already (N, C, 4*KK, S)
    # and the combined columns reshape into the kernel layout with no big
    # transposes.  Corners: (y0,x0), (y0,x1), (y1,x0), (y1,x1).
    cdy = jnp.array([0.0, 0.0, 1.0, 1.0]).reshape(1, 4, 1, 1, 1)
    cdx = jnp.array([0.0, 1.0, 0.0, 1.0]).reshape(1, 4, 1, 1, 1)
    yc = y0[:, None] + cdy                                       # (N, 4, KK, ho, wo)
    xc = x0[:, None] + cdx
    in_rng = (yc >= 0) & (yc <= H - 1) & (xc >= 0) & (xc <= W - 1)
    yi = jnp.clip(yc, 0, H - 1).astype(jnp.int32)
    xi = jnp.clip(xc, 0, W - 1).astype(jnp.int32)
    idx = yi * W + xi                                            # (N, 4, KK, ho, wo)
    bw = jnp.stack([hy * hx, hy * lx, ly * hx, ly * lx], axis=1)
    mw = (bw * in_rng.astype(jnp.float32)
          * valid[:, None].astype(jnp.float32) * mask[:, None])  # (N, 4, KK, ho, wo)

    # --- bilinear corner gather: stays in XLA (data-dependent gather has no
    # clean Pallas TPU primitive).
    # TODO(synk): an (N, H*W, C) gather source would give contiguous C-length
    # reads but then needs a C<->S relayout of the combined stream before the
    # kernel; we keep the transpose-free layout instead.
    x_src = x.reshape(N, C, 1, H * W).astype(jnp.bfloat16)
    v = jnp.take_along_axis(x_src, idx.reshape(N, 1, 4 * KK, S), axis=3)
    # Corner combine * modulation in XLA (elementwise -> fuses with the gather
    # consumer); the 4-corner tensor never reaches the Pallas kernel.
    v = v.reshape(N, C, 4, KK, S).astype(jnp.float32)
    cols = jnp.sum(v * mw.reshape(N, 1, 4, KK, S), axis=2)       # (N, C, KK, S) f32
    cols = cols.reshape(N, C * KK, S).astype(jnp.bfloat16)       # kernel stream

    out = deform_matmul(weight, bias, cols)                      # (N, OC_pad, S) f32
    if out.shape[1] != OC:
        out = out[:, :OC]
    return out.reshape(N, OC, ho, wo)                            # no transpose needed


def init_params(key, in_channels, out_channels, kernel_size=3):
    K = kernel_size
    n = in_channels * K * K
    stdv = 1.0 / math.sqrt(n)
    weight = jax.random.uniform(
        key, (out_channels, in_channels, K, K), jnp.float32, minval=-stdv, maxval=stdv)
    bias = jnp.zeros((out_channels,), jnp.float32)
    # conv_offset_mask is zero-initialized per the module's _init_weight().
    w_om = jnp.zeros((3 * K * K, in_channels, K, K), jnp.float32)
    b_om = jnp.zeros((3 * K * K,), jnp.float32)
    return {"weight": weight, "bias": bias,
            "conv_offset_mask_w": w_om, "conv_offset_mask_b": b_om}


if __name__ == "__main__":
    key = jax.random.PRNGKey(0)
    k_x, k_w = jax.random.split(key)

    in_channels, out_channels, K, stride, padding = 4, 8, 3, (1, 1), 1
    x = jax.random.normal(k_x, (2, in_channels, 16, 16), jnp.float32)
    params = init_params(k_w, in_channels, out_channels, K)

    fwd = jax.jit(functools.partial(deform_conv2d_forward, kernel_size=K,
                                    stride=stride, padding=padding))
    out = fwd(x, params)
    out = jax.block_until_ready(out)
    assert out.shape == (2, out_channels, 16, 16), out.shape

    # Sanity: zero-init offsets, mask = sigmoid(0) = 0.5
    #   => deformable conv == 0.5 * standard conv + bias.
    ref = lax.conv_general_dilated(
        x, params["weight"], window_strides=stride,
        padding=[(padding, padding), (padding, padding)],
        dimension_numbers=("NCHW", "OIHW", "NCHW"))
    ref = 0.5 * ref + params["bias"][None, :, None, None]
    err = float(jnp.max(jnp.abs(out - ref)))
    # bf16 columns/weights on the MXU with f32 accumulation (deliberate).
    assert jnp.allclose(out, ref, atol=5e-2, rtol=5e-2), err

    print("KERNEL_OK")
</pallas_src>

<mosaic_0001>
module attributes {stable_mosaic.version = 11 : i64} {
  func.func @_deform_matmul_kernel(%arg0: i32, %arg1: i32, %arg2: memref<8x36xbf16, #tpu.memory_space<vmem>>, %arg3: memref<8x1xf32, #tpu.memory_space<vmem>>, %arg4: memref<1x36x128xbf16, #tpu.memory_space<vmem>>, %arg5: memref<1x8x128xf32, #tpu.memory_space<vmem>>) attributes {dimension_semantics = [#tpu.dimension_semantics<parallel>, #tpu.dimension_semantics<parallel>], iteration_bounds = array<i64: 2, 2>, scalar_prefetch = 0 : i64, scratch_operands = 0 : i64, tpu.core_type = #tpu.core_type<tc>, window_params = [{pipeline_mode = #tpu.pipeline_mode<synchronous>, transform_indices = @transform_0, window_bounds = array<i64: 8, 36>}, {pipeline_mode = #tpu.pipeline_mode<synchronous>, transform_indices = @transform_1, window_bounds = array<i64: 8, 1>}, {transform_indices = @transform_2, window_bounds = array<i64: 1, 36, 128>}, {transform_indices = @transform_3, window_bounds = array<i64: 1, 8, 128>}]} {
    %c0 = arith.constant 0 : index
    %c0_0 = arith.constant 0 : index
    %0 = vector.load %arg2[%c0, %c0_0] : memref<8x36xbf16, #tpu.memory_space<vmem>>, vector<8x36xbf16>
    %c0_1 = arith.constant 0 : index
    %c0_2 = arith.constant 0 : index
    %c0_3 = arith.constant 0 : index
    %1 = vector.load %arg4[%c0_1, %c0_2, %c0_3] : memref<1x36x128xbf16, #tpu.memory_space<vmem>>, vector<1x36x128xbf16>
    %2 = vector.shape_cast %1 : vector<1x36x128xbf16> to vector<36x128xbf16>
    %cst = arith.constant dense<0.000000e+00> : vector<8x128xf32>
    %3 = tpu.matmul %0, %2, %cst {dimension_numbers = #tpu.dot_dimension_numbers<[1], [0], [0], [1], [0, 0, 1, 1], [], []>} : vector<8x36xbf16>, vector<36x128xbf16>, vector<8x128xf32> -> vector<8x128xf32>
    %c0_4 = arith.constant 0 : index
    %c0_5 = arith.constant 0 : index
    %4 = vector.load %arg3[%c0_4, %c0_5] : memref<8x1xf32, #tpu.memory_space<vmem>>, vector<8x1xf32>
    %5 = vector.broadcast %4 : vector<8x1xf32> to vector<8x128xf32>
    %6 = arith.addf %3, %5 : vector<8x128xf32>
    %c0_6 = arith.constant 0 : index
    %c0_7 = arith.constant 0 : index
    %c0_8 = arith.constant 0 : index
    %7 = vector.load %arg5[%c0_6, %c0_7, %c0_8] : memref<1x8x128xf32, #tpu.memory_space<vmem>>, vector<1x8x128xf32>
    %8 = vector.shape_cast %7 : vector<1x8x128xf32> to vector<8x128xf32>
    %9 = vector.shape_cast %6 : vector<8x128xf32> to vector<1x8x128xf32>
    tpu.vector_store %arg5[%c0_6, %c0_7, %c0_8], %9 {strides = array<i32>} : memref<1x8x128xf32, #tpu.memory_space<vmem>>, vector<1x8x128xf32>,
    return
  }
  func.func @transform_0(%arg0: i32, %arg1: i32) -> (i32, i32) {
    %c0_i32 = arith.constant 0 : i32
    %c0_i32_0 = arith.constant 0 : i32
    %c0_i32_1 = arith.constant 0 : i32
    return %c0_i32, %c0_i32_0 : i32, i32
  }
  func.func @transform_1(%arg0: i32, %arg1: i32) -> (i32, i32) {
    %c0_i32 = arith.constant 0 : i32
    %c0_i32_0 = arith.constant 0 : i32
    %c0_i32_1 = arith.constant 0 : i32
    return %c0_i32, %c0_i32_0 : i32, i32
  }
  func.func @transform_2(%arg0: i32, %arg1: i32) -> (i32, i32, i32) {
    %c0_i32 = arith.constant 0 : i32
    %c0_i32_0 = arith.constant 0 : i32
    return %arg0, %c0_i32, %arg1 : i32, i32, i32
  }
  func.func @transform_3(%arg0: i32, %arg1: i32) -> (i32, i32, i32) {
    %c0_i32 = arith.constant 0 : i32
    %c0_i32_0 = arith.constant 0 : i32
    return %arg0, %c0_i32, %arg1 : i32, i32, i32
  }
}

</mosaic_0001>

<bundles_post_ra>
// kernel: deform_conv2d_forward.1
= control target key start
LH: loop header
LB: loop body
LE: loop exit
PB: predicated region body
PF: predicated region fallthrough
CT: control target
= control target key end

     0   :  { %s590_s12 = smov 0   ;;  %s592_s13 = smov 0   ;;  %s687_s0 = inlined_call_operand.vmem [shape: bf16[8,36], index: 0, kind: input, shape index: {}]   ;;  %s688_s1 = inlined_call_operand.vmem [shape: f32[8,1], index: 1, kind: input, shape index: {}]   ;;  %s689_s2 = inlined_call_operand.vmem [shape: bf16[2,36,256], index: 2, kind: input, shape index: {}]   ;;  %s690_s3 = inlined_call_operand.vmem [shape: f32[2,8,256], index: 3, kind: output, shape index: {}]  }
   0x1   :  { %s594_s14 = smov 0   ;;  %s596_s15 = smov 0  }
   0x2   :  { %s598_s16 = smov 0   ;;  %s600_s17 = smov 0  }
   0x3   :  { %s602_s18 = smov 0  }
   0x4 LB: > { %s22_s19 = sadd.s32 1, %s557_s16  ;;  %s25_s20 = sadd.s32 1, %s561_s17  ;;  %s565_s18 = sphi %s602_s18, %s13_s18   ;;  %s561_s17 = sphi %s600_s17, %s696_s17   ;;  %s557_s16 = sphi %s598_s16, %s695_s16   ;;  %s553_s15 = sphi %s596_s15, %s694_s15   ;;  %s549_s14 = sphi %s594_s14, %s693_s14   ;;  %s545_s13 = sphi %s592_s13, %s692_s13   ;;  %s541_s12 = sphi %s590_s12, %s691_s12  }
   0x5   : > { %p23_p0 = scmp.ge.s32.totalorder %s22_s19, 2  ;;  %p83_p1 = scmp.ne.s32.totalorder %s545_s13, %s541_s12 }
   0x6   : > { %p84_p2 = scmp.eq.s32.totalorder %s565_s18, 0  ;;  %s76_s24 = sadd.s32 1, %s545_s13 }
   0x7   : > { %s698_s19 = smov (%p23_p0, %s22_s19), 0  ;;  %s700_s20 = smov (!%p23_p0, %s25_s20), %s561_s17 }
   0x8   : > { %p85_p3 = por %p84_p2, %p83_p1  ;;  %p27_p4 = scmp.ge.s32.totalorder %s700_s20, 2 }
   0x9   : > { %s72_s21 = ssub.s32 %s557_s16, %s698_s19  ;;  %p420_p6 = scmp.ge.s32.totalorder %s565_s18, 4 }
   0xa   : > { %s702_s20 = smov (%p27_p4, %s700_s20), 0 }
   0xb   : > { %s71_s22 = ssub.s32 %s561_s17, %s702_s20  ;;  %143 = sbr.rel (%p420_p6) target bundleno = 28 (0x1c), region = 24 }
   0xc   : > { %s73_s23 = sor.u32 %s72_s21, %s71_s22 }
   0xd   : > { %p74_p5 = scmp.eq.s32.totalorder %s73_s23, 0 }
   0xf   : > { %s641_s25 = scalar_select %p74_p5, %s545_s13, %s76_s24  }
  0x12   : > { %146 = sbr.rel (!%p85_p3) target bundleno = 28 (0x1c), region = 28  ;;  %s148_s26 = sand.u32 (%p85_p3), 1, %s545_s13  }
  0x13   : > { %s446_s27 = smul.u32 (%p85_p3), 10, %s561_s17 }
  0x14   : > { %s445_s28 = smul.u32 (%p85_p3), 20, %s148_s26 }
  0x15   : > { %s152_s29 = sadd.s32 (%p85_p3), %s557_s16, %s446_s27 }
  0x16   : > { %s421_s30 = sshll.u32 (%p85_p3), %s152_s29, 2  ;;  %s150_s7 = scalar_lea.vmem (%p85_p3), [#allocation2], %s445_s28 }
  0x17   : > { %s154_s6 = scalar_lea.vmem (%p85_p3), %s689_s2, %s421_s30 }
  0x18   : > { %v170_v0 = vld [vmem:[%s154_s6] sm:$0xf] (%p85_p3)  ;;  %v172_v1 = vld [vmem:[%s154_s6 + $0x8] sm:$0xf] (%p85_p3)  ;;  %v174_v2 = vld [vmem:[%s154_s6 + $0x10] sm:$0xf] (%p85_p3) }
  0x19   : > { %171 = vst [vmem:[%s150_s7] sm:$0xf] %v170_v0  ;;  %173 = vst [vmem:[%s150_s7 + $0x4] sm:$0xf] %v172_v1  ;;  %v176_v3 = vld [vmem:[%s154_s6 + $0x18] sm:$0xf] }
  0x1a   : > { %175 = vst [vmem:[%s150_s7 + $0x8] sm:$0xf] %v174_v2  ;;  %v178_v4 = vld [vmem:[%s154_s6 + $0x20] sm:$0xf]  ;;  %177 = vst [vmem:[%s150_s7 + $0xc] sm:$0xf] %v176_v3 }
  0x1b   : > { %179 = vst [vmem:[%s150_s7 + $0x10] sm:$0xf] %v178_v4 }
  0x1c PF: > { %p422_p7 = scmp.ge.s32.totalorder %s565_s18, 1  ;;  %p211_p8 = scmp.lt.s32.totalorder %s565_s18, 5 }
  0x1e   : > { %p212_p9 = pnand %p422_p7, %p211_p8 }
  0x1f   : > { %s218_s8 = sand.u32 (!%p212_p9), 1, %s541_s12   ;;  %v567_v5 = vmov (!%p212_p9), 0.0   ;;  %vm568_vm0 = vmmov (!%p212_p9), 0   ;;  %v259_v6 = vld [vmem:[%s688_s1] sm:$0xff] (!%p212_p9)  ;;  %v569_v7 = vmov (!%p212_p9), 0   ;;  %vm284_vm1 = vcmask (!%p212_p9), 1041408  }
  0x20   : > { %215 = sbr.rel (%p212_p9) target bundleno = 263 (0x107), region = 69  ;;  %435 = vmatprep.subr.bf16.mxu0 (!%p212_p9), %v567_v5  ;;  %441 = vmatprep.mubr.msk.bf16.mxu0 (!%p212_p9), %vm568_vm0, %v567_v5  ;;  %v253_v12 = vld [vmem:[%s687_s0] sm:$0xf] (!%p212_p9)  ;;  %vm280_vm2 = vcmask (!%p212_p9), 293888   ;;  %p244_p10 = scmp.lt.s32.totalorder (!%p212_p9), %s553_s15, 1 }
  0x21   : > { %s447_s9 = smul.u32 (!%p212_p9), 20, %s218_s8  ;;  %507 = vset.pattern.permute.xlu0 (!%p212_p9), %v569_v7  ;;  %p246_p11 = scmp.lt.s32.totalorder (!%p212_p9), %s549_s14, 1 }
  0x22   : > { %262 = vperm.xlu0 (!%p212_p9), %507, %v259_v6  }
  0x23   : > { %s220_s21 = scalar_lea.vmem (!%p212_p9), [#allocation2], %s447_s9 }
  0x24   : > { %v508_v8 = vld [vmem:[%s220_s21] sm:$0xff] (!%p212_p9)   ;;  %v509_v9 = vld [vmem:[%s220_s21 + $0x8] sm:$0xff] (!%p212_p9)   ;;  %v510_v10 = vld [vmem:[%s220_s21 + $0x10] ss:$0 sps:$4 sm:$0x33] (!%p212_p9)  }
  0x25   : > { %436 = vmatpush3.bf16.msra.mxu0 (!%p212_p9), %v508_v8  ;;  %v286_v11 = vsel (!%p212_p9), %vm284_vm1, %v510_v10, 0 }
  0x26   : > { %437 = vmatprep.subr.bf16.mxu0 (!%p212_p9), %v567_v5 }
  0x27   : > { %s704_s15 = smov (!%p244_p10, %s553_s15), 1  ;;  %s706_s14 = smov (!%p246_p11, %s549_s14), 1 }
  0x28   : > { %s423_s23 = sshll.u32 %s704_s15, 1 }
  0x29   : > { %438 = vmatpush3.bf16.msra.mxu0 %v509_v9  ;;  %s249_s24 = sadd.s32 %s423_s23, %s706_s14 }
  0x2a   : > { %439 = vmatprep.subr.bf16.mxu0 %v567_v5  ;;  %s424_s26 = sshll.u32 %s249_s24, 3 }
  0x2b   : > { %s251_s29 = scalar_lea.vmem %s690_s3, %s424_s26 }
  0x2d   : > { %440 = vmatpush3.bf16.msra.mxu0 %v286_v11 }
  0x30   : > { %442 = vmatmul.mubr.msk.bf16.vlgmr.msra.gmra.mrb[0].mxu0 %vm280_vm2, %v253_v12 }
  0xa1   : > { %v263_v13 = vpop.permute.xlu0 %262 }
 0x103   : > { %v322_v14 = vpop.f32.mrb[0].mxu0 }
 0x104   : > { %v323_v15 = vadd.f32 %v322_v14, %v263_v13  ;;  %v443_v16 = vpop.f32.mrb[1].mxu0 }
 0x105   : > { %v325_v17 = vpop.f32.mrb[2].mxu0 }
 0x106   : > { %328 = vst [vmem:[%s251_s29] sm:$0xff] %v323_v15  ;;  %v444_v18 = vpop.f32.mrb[3].mxu0 }
 0x107 PF: > { %s13_s18 = sadd.s32 1, %s565_s18   ;;  %s691_s12 = smov %s545_s13 }
 0x108   : > { %p10_p12 = scmp.ge.s32.totalorder %s13_s18, 6   ;;  %s692_s13 = smov %s641_s25 }
 0x109   : > { %s693_s14 = smov %s557_s16  ;;  %s694_s15 = smov %s561_s17 }
 0x10a   : > { %s695_s16 = smov %s698_s19  ;;  %s696_s17 = smov %s702_s20 }
 0x10b   :  { %12 = sbr.rel (!%p10_p12) target bundleno = 4 (0x4), region = 108 }

</bundles_post_ra>
